<compile_context>
chip_gen: v7x
topology: tpu7x:2x2x1
jax: 0.10.0
libtpu: 0.0.40
codegen_flags: <defaults>
</compile_context>

<pallas_src>
import functools

import jax
import jax.numpy as jnp
from jax import lax
from jax.experimental import pallas as pl
from jax.experimental.pallas import tpu as pltpu

GAMMA = 2.0
ALPHA = 0.25
LANE = 128
SUBLANE = 8
CHUNK_ROWS = 512            # in-kernel row chunk: 512*128*4B = 256 KiB per f32 temp
TARGET_BLOCK_ROWS = 8192    # 8192*128*4B = 4 MiB per f32 input block (16 MiB double-buffered)
VMEM_LIMIT_BYTES = 40 * 1024 * 1024


def _round_up(x, m):
    return ((x + m - 1) // m) * m


def _focal_terms(x, y, gamma, alpha, approx_recip):
    """Per-element focal loss from f32 logits x and targets y (in-kernel only)."""
    # Numerically stable BCE-with-logits: max(x,0) - x*y + log1p(exp(-|x|)).
    t = jnp.exp(-jnp.abs(x))                               # reused by sigmoid below
    bce = jnp.maximum(x, 0.0) - x * y + jnp.log1p(t)

    # sigmoid(x) from t = exp(-|x|):  x >= 0 -> 1/(1+t),  x < 0 -> t/(1+t).
    if approx_recip:
        inv_1pt = pl.reciprocal(1.0 + t, approx=True)      # single EUP vrcp
    else:
        inv_1pt = 1.0 / (1.0 + t)
    sig = jnp.where(x >= 0.0, inv_1pt, t * inv_1pt)

    # 1 - p_t = sig + y*(1 - 2*sig);  alpha_factor = (1-alpha) + y*(2*alpha - 1)  (FMA form)
    one_minus_pt = sig + y * (1.0 - 2.0 * sig)
    alpha_factor = (1.0 - alpha) + y * (2.0 * alpha - 1.0)
    if gamma == 2.0:
        modulating = one_minus_pt * one_minus_pt
    else:
        modulating = one_minus_pt ** gamma
    return bce * alpha_factor * modulating


def _focal_kernel(pred_ref, true_ref, out_ref, *, gamma, alpha, block_rows,
                  chunk_rows, total_rows, need_row_mask, approx_recip):
    i = pl.program_id(0)
    n_chunks = block_rows // chunk_rows

    def block_partial(masked):
        # Rows of this block holding real data (only consulted on the masked last block).
        rows_valid = total_rows - i * block_rows

        def body(c, acc):
            r0 = pl.multiple_of(c * chunk_rows, chunk_rows)
            x = pred_ref[pl.ds(r0, chunk_rows), :].astype(jnp.float32)
            y = true_ref[pl.ds(r0, chunk_rows), :].astype(jnp.float32)
            loss = _focal_terms(x, y, gamma, alpha, approx_recip)
            if masked:
                # Block-local row index (never overflows int32); squashes any NaN/Inf
                # coming from the unfilled tail of the final partial block.
                row = r0 + lax.broadcasted_iota(jnp.int32, (chunk_rows, LANE), 0)
                loss = jnp.where(row < rows_valid, loss, 0.0)
            # Pure-VPU fold into an (8,128) vreg accumulator (chunk_rows % 8 == 0).
            return acc + loss.reshape(-1, SUBLANE, LANE).sum(axis=0)

        acc0 = jnp.zeros((SUBLANE, LANE), jnp.float32)
        return lax.fori_loop(0, n_chunks, body, acc0, unroll=True)

    if need_row_mask:
        last = pl.num_programs(0) - 1

        @pl.when(i != last)
        def _():
            out_ref[0] = block_partial(masked=False)

        @pl.when(i == last)
        def _():
            out_ref[0] = block_partial(masked=True)
    else:
        out_ref[0] = block_partial(masked=False)


def _focal_elem_sum(x, y, gamma, alpha):
    """Plain-JAX focal loss sum (used only for the <128-element lane tail)."""
    x = x.astype(jnp.float32)
    y = y.astype(jnp.float32)
    bce = jnp.maximum(x, 0.0) - x * y + jnp.log1p(jnp.exp(-jnp.abs(x)))
    p = jax.nn.sigmoid(x)
    p_t = y * p + (1.0 - y) * (1.0 - p)
    alpha_factor = y * alpha + (1.0 - y) * (1.0 - alpha)
    return jnp.sum(bce * alpha_factor * (1.0 - p_t) ** gamma, dtype=jnp.float32)


def focal_loss(pred, true, gamma=GAMMA, alpha=ALPHA, approx_reciprocal=True):
    """Pallas focal loss (mean over all elements). pred/true: same shape; returns f32 scalar."""
    assert pred.shape == true.shape
    n_valid = pred.size
    flat_p = pred.reshape(-1)   # reshape of a contiguous array: no copy
    flat_t = true.reshape(-1)

    m_rows = n_valid // LANE    # full lane-dense rows streamed by the kernel
    bulk = m_rows * LANE
    rem = n_valid - bulk

    partial_sum = jnp.float32(0.0)

    if m_rows > 0:
        if rem:
            # TODO(synk): XLA may still materialize this prefix slice; hit only when
            # size % 128 != 0 (rare for NCHW maps). The concat/pad + mask-stream path is gone.
            p2d = flat_p[:bulk].reshape(m_rows, LANE)
            t2d = flat_t[:bulk].reshape(m_rows, LANE)
        else:
            p2d = flat_p.reshape(m_rows, LANE)
            t2d = flat_t.reshape(m_rows, LANE)

        chunk = min(CHUNK_ROWS, _round_up(m_rows, SUBLANE))
        block_rows = min(_round_up(m_rows, chunk), TARGET_BLOCK_ROWS)
        num_blocks = pl.cdiv(m_rows, block_rows)
        need_row_mask = (num_blocks * block_rows != m_rows)

        kernel = functools.partial(
            _focal_kernel, gamma=gamma, alpha=alpha, block_rows=block_rows,
            chunk_rows=chunk, total_rows=m_rows, need_row_mask=need_row_mask,
            approx_recip=approx_reciprocal)

        cost = pl.CostEstimate(
            flops=18 * bulk,
            transcendentals=3 * bulk,
            bytes_accessed=2 * bulk * p2d.dtype.itemsize
                           + num_blocks * SUBLANE * LANE * 4)

        partials = pl.pallas_call(
            kernel,
            out_shape=jax.ShapeDtypeStruct((num_blocks, SUBLANE, LANE), jnp.float32),
            grid_spec=pltpu.PrefetchScalarGridSpec(
                num_scalar_prefetch=0,
                grid=(num_blocks,),
                in_specs=[
                    pl.BlockSpec((block_rows, LANE), lambda i: (i, 0)),
                    pl.BlockSpec((block_rows, LANE), lambda i: (i, 0)),
                ],
                out_specs=pl.BlockSpec((1, SUBLANE, LANE), lambda i: (i, 0, 0)),
            ),
            compiler_params=pltpu.CompilerParams(
                # No cross-step carry -> safe to shard the grid across TensorCores (v7x).
                dimension_semantics=("parallel",),
                vmem_limit_bytes=VMEM_LIMIT_BYTES,
            ),
            cost_estimate=cost,
        )(p2d, t2d)

        partial_sum = jnp.sum(partials, dtype=jnp.float32)

    if rem:
        partial_sum = partial_sum + _focal_elem_sum(flat_p[bulk:], flat_t[bulk:],
                                                    gamma, alpha)

    return partial_sum / jnp.float32(n_valid)


def _focal_loss_ref(pred, true, gamma=GAMMA, alpha=ALPHA):
    x = pred.astype(jnp.float32)
    y = true.astype(jnp.float32)
    bce = jnp.maximum(x, 0.0) - x * y + jnp.log1p(jnp.exp(-jnp.abs(x)))
    p = jax.nn.sigmoid(x)
    p_t = y * p + (1 - y) * (1 - p)
    alpha_factor = y * alpha + (1 - y) * (1 - alpha)
    return jnp.mean(bce * alpha_factor * (1.0 - p_t) ** gamma)


if __name__ == "__main__":
    key = jax.random.PRNGKey(0)
    kp, kt, kp2, kt2 = jax.random.split(key, 4)

    # Detection-head-like logits: NCHW = (2, 4, 16, 16) -> 2048 elements (16 lane rows).
    pred = jax.random.normal(kp, (2, 4, 16, 16), dtype=jnp.float32)
    true = (jax.random.uniform(kt, (2, 4, 16, 16)) > 0.7).astype(jnp.float32)

    ref = _focal_loss_ref(pred, true)

    # Default path (approximate EUP reciprocal) -- looser tolerance.
    out = jax.block_until_ready(focal_loss(pred, true))
    assert jnp.allclose(out, ref, rtol=1e-2, atol=1e-4), (out, ref)

    # Exact-reciprocal path -- tight tolerance against the reference.
    out_exact = jax.block_until_ready(focal_loss(pred, true, approx_reciprocal=False))
    assert jnp.allclose(out_exact, ref, rtol=1e-5, atol=1e-6), (out_exact, ref)

    # Ragged size: exercises the last-block row mask + plain-JAX lane tail (no padding copy).
    pred_r = jax.random.normal(kp2, (2, 5, 131), dtype=jnp.float32)   # 1310 elements
    true_r = (jax.random.uniform(kt2, (2, 5, 131)) > 0.5).astype(jnp.float32)
    out_r = jax.block_until_ready(focal_loss(pred_r, true_r, approx_reciprocal=False))
    ref_r = _focal_loss_ref(pred_r, true_r)
    assert jnp.allclose(out_r, ref_r, rtol=1e-5, atol=1e-6), (out_r, ref_r)

    print("KERNEL_OK")
</pallas_src>

<mosaic_0001>
module attributes {stable_mosaic.version = 11 : i64} {
  func.func @_focal_kernel(%arg0: i32, %arg1: memref<16x128xf32, #tpu.memory_space<vmem>>, %arg2: memref<16x128xf32, #tpu.memory_space<vmem>>, %arg3: memref<1x8x128xf32, #tpu.memory_space<vmem>>) attributes {dimension_semantics = [#tpu.dimension_semantics<parallel>], iteration_bounds = array<i64: 1>, scalar_prefetch = 0 : i64, scratch_operands = 0 : i64, tpu.core_type = #tpu.core_type<tc>, window_params = [{transform_indices = @transform_0, window_bounds = array<i64: 16, 128>}, {transform_indices = @transform_1, window_bounds = array<i64: 16, 128>}, {transform_indices = @transform_2, window_bounds = array<i64: 1, 8, 128>}]} {
    %cst = arith.constant 0.000000e+00 : f32
    %0 = vector.broadcast %cst : f32 to vector<8x128xf32>
    %c0_i32 = arith.constant 0 : i32
    %c16_i32 = arith.constant 16 : i32
    %1 = arith.muli %c0_i32, %c16_i32 : i32
    %2 = tpu.assume_multiple %1, 16 : i32
    %3 = arith.index_cast %2 : i32 to index
    %c0 = arith.constant 0 : index
    %4 = vector.load %arg1[%3, %c0] : memref<16x128xf32, #tpu.memory_space<vmem>>, vector<16x128xf32>
    %5 = arith.index_cast %2 : i32 to index
    %c0_0 = arith.constant 0 : index
    %6 = vector.load %arg2[%5, %c0_0] : memref<16x128xf32, #tpu.memory_space<vmem>>, vector<16x128xf32>
    %7 = math.absf %4 : vector<16x128xf32>
    %cst_1 = arith.constant 0.000000e+00 : f32
    %8 = vector.broadcast %cst_1 : f32 to vector<16x128xf32>
    %9 = arith.subf %8, %7 : vector<16x128xf32>
    %10 = math.exp %9 : vector<16x128xf32>
    %cst_2 = arith.constant 0.000000e+00 : f32
    %11 = vector.broadcast %cst_2 : f32 to vector<16x128xf32>
    %12 = arith.maximumf %4, %11 : vector<16x128xf32>
    %13 = arith.mulf %4, %6 : vector<16x128xf32>
    %14 = arith.subf %12, %13 : vector<16x128xf32>
    %15 = math.log1p %10 : vector<16x128xf32>
    %16 = arith.addf %14, %15 : vector<16x128xf32>
    %cst_3 = arith.constant 1.000000e+00 : f32
    %17 = vector.broadcast %cst_3 : f32 to vector<16x128xf32>
    %18 = arith.addf %17, %10 : vector<16x128xf32>
    %19 = tpu.reciprocal %18 {approx = true} : vector<16x128xf32> -> vector<16x128xf32>
    %cst_4 = arith.constant 0.000000e+00 : f32
    %20 = vector.broadcast %cst_4 : f32 to vector<16x128xf32>
    %21 = arith.cmpf oge, %4, %20 : vector<16x128xf32>
    %22 = arith.mulf %10, %19 : vector<16x128xf32>
    %23 = arith.select %21, %19, %22 : vector<16x128xi1>, vector<16x128xf32>
    %cst_5 = arith.constant 2.000000e+00 : f32
    %24 = vector.broadcast %cst_5 : f32 to vector<16x128xf32>
    %25 = arith.mulf %24, %23 : vector<16x128xf32>
    %cst_6 = arith.constant 1.000000e+00 : f32
    %26 = vector.broadcast %cst_6 : f32 to vector<16x128xf32>
    %27 = arith.subf %26, %25 : vector<16x128xf32>
    %28 = arith.mulf %6, %27 : vector<16x128xf32>
    %29 = arith.addf %23, %28 : vector<16x128xf32>
    %cst_7 = arith.constant -5.000000e-01 : f32
    %30 = vector.broadcast %cst_7 : f32 to vector<16x128xf32>
    %31 = arith.mulf %6, %30 : vector<16x128xf32>
    %cst_8 = arith.constant 7.500000e-01 : f32
    %32 = vector.broadcast %cst_8 : f32 to vector<16x128xf32>
    %33 = arith.addf %32, %31 : vector<16x128xf32>
    %34 = arith.mulf %29, %29 : vector<16x128xf32>
    %35 = arith.mulf %16, %33 : vector<16x128xf32>
    %36 = arith.mulf %35, %34 : vector<16x128xf32>
    %37 = vector.shape_cast %36 : vector<16x128xf32> to vector<2x8x128xf32>
    %cst_9 = arith.constant dense<0.000000e+00> : vector<8x128xf32>
    %38 = vector.multi_reduction <add>, %37, %cst_9 [0] : vector<2x8x128xf32> to vector<8x128xf32>
    %39 = arith.addf %0, %38 : vector<8x128xf32>
    %c1_i32 = arith.constant 1 : i32
    %c0_10 = arith.constant 0 : index
    %c0_11 = arith.constant 0 : index
    %c0_12 = arith.constant 0 : index
    %40 = vector.load %arg3[%c0_10, %c0_11, %c0_12] : memref<1x8x128xf32, #tpu.memory_space<vmem>>, vector<1x8x128xf32>
    %41 = vector.shape_cast %40 : vector<1x8x128xf32> to vector<8x128xf32>
    %42 = vector.shape_cast %39 : vector<8x128xf32> to vector<1x8x128xf32>
    tpu.vector_store %arg3[%c0_10, %c0_11, %c0_12], %42 {strides = array<i32>} : memref<1x8x128xf32, #tpu.memory_space<vmem>>, vector<1x8x128xf32>,
    return
  }
  func.func @transform_0(%arg0: i32) -> (i32, i32) {
    %c0_i32 = arith.constant 0 : i32
    %c0_i32_0 = arith.constant 0 : i32
    return %arg0, %c0_i32 : i32, i32
  }
  func.func @transform_1(%arg0: i32) -> (i32, i32) {
    %c0_i32 = arith.constant 0 : i32
    %c0_i32_0 = arith.constant 0 : i32
    return %arg0, %c0_i32 : i32, i32
  }
  func.func @transform_2(%arg0: i32) -> (i32, i32, i32) {
    %c0_i32 = arith.constant 0 : i32
    %c0_i32_0 = arith.constant 0 : i32
    %c0_i32_1 = arith.constant 0 : i32
    return %arg0, %c0_i32, %c0_i32_0 : i32, i32, i32
  }
}

</mosaic_0001>

<bundles_post_ra>
// kernel: tpu_custom_call.1
= control target key start
LH: loop header
LB: loop body
LE: loop exit
PB: predicated region body
PF: predicated region fallthrough
CT: control target
= control target key end

     0   :  { %7 = vsyncpa [#allocation3], 0  ;;  %s282_s0 = inlined_call_operand.hbm [shape: f32[16,128], index: 0, kind: input, shape index: {}]   ;;  %s283_s1 = inlined_call_operand.hbm [shape: f32[16,128], index: 1, kind: input, shape index: {}]   ;;  %s284_s2 = inlined_call_operand.hbm [shape: f32[1,8,128], index: 2, kind: output, shape index: {}]  }
   0x1   :  { %8 = vsyncpa [#allocation6], 0 }
   0x2   :  { %9 = vsyncpa [#allocation4], 0  ;;  %s214_s9 = smov [#allocation2]   ;;  %s142_s13 = scalar_lea.hbm %s282_s0, 256 }
   0x3   :  { %s15_s10 = sshll.u32 %s214_s9, 4  ;;  %p143_p0 = scmp.ne.s32.totalorder %s282_s0, %s142_s13  ;;  %s16_s10 = int_to_ptr.vmem [resolvable:$true] %s15_s10 }
   0x4   :  { %p146_p1 = scmp.lt.u32.totalorder %s142_s13, %s282_s0 }
   0x6   :  { %p148_p2 = pnand %p146_p1, %p143_p0 }
   0x8   :  { %151 = shalt.err (!%p148_p2)
}
   0x9   :  { %s152_s18 = scalar_lea.vmem %s16_s10, 256  ;;  %p157_p4 = scmp.lt.s32.totalorder %s16_s10, %s16_s10 }
   0xa   :  { %p153_p3 = scmp.ne.s32.totalorder %s16_s10, %s152_s18  ;;  %p158_p5 = scmp.lt.s32.totalorder %s152_s18, %s152_s18 }
   0xc   :  { %p159_p6 = por %p158_p5, %p157_p4 }
   0xe   :  { %p160_p7 = pnand %p159_p6, %p153_p3 }
  0x10   :  { %163 = shalt.err (!%p160_p7)
}
  0x11   :  { %s215_s19 = smov 128   ;;  %s216_s20 = smov 8  }
  0x12   :  { %21 = dma.hbm_to_vmem [thread:$0]  %s282_s0, 256, %s16_s10, [#allocation3], %s215_s19, %s215_s19, %s216_s20  }
  0x13   :  { %s217_s23 = smov [#allocation5]   ;;  %s164_s27 = scalar_lea.hbm %s283_s1, 256 }
  0x14   :  { %s27_s24 = sshll.u32 %s217_s23, 4  ;;  %p165_p8 = scmp.ne.s32.totalorder %s283_s1, %s164_s27  ;;  %s28_s24 = int_to_ptr.vmem [resolvable:$true] %s27_s24 }
  0x15   :  { %p168_p9 = scmp.lt.u32.totalorder %s164_s27, %s283_s1 }
  0x17   :  { %p170_p10 = pnand %p168_p9, %p165_p8 }
  0x19   :  { %173 = shalt.err (!%p170_p10)
}
  0x1a   :  { %s174_s4 = scalar_lea.vmem %s28_s24, 256  ;;  %p179_p12 = scmp.lt.s32.totalorder %s28_s24, %s28_s24 }
  0x1b   :  { %p175_p11 = scmp.ne.s32.totalorder %s28_s24, %s174_s4  ;;  %p180_p13 = scmp.lt.s32.totalorder %s174_s4, %s174_s4 }
  0x1d   :  { %p181_p0 = por %p180_p13, %p179_p12 }
  0x1f   :  { %p182_p1 = pnand %p181_p0, %p175_p11 }
  0x21   :  { %185 = shalt.err (!%p182_p1)
}
  0x22   :  { %33 = dma.hbm_to_vmem [thread:$0]  %s283_s1, 256, %s28_s24, [#allocation6], %s215_s19, %s215_s19, %s216_s20  }
  0x23   :  { %208 = dma.done.wait [#allocation3], 256  }
  0x24   :  { %209 = vsyncadd [#allocation3], 4294967040 }
  0x25   :  { %210 = dma.done.wait [#allocation6], 256  }
  0x26   :  { %211 = vsyncadd [#allocation6], 4294967040  ;;  %v40_v0 = vld [vmem:[#allocation2] sm:$0xff]  ;;  %v41_v1 = vld [vmem:[#allocation2 + $0x8] sm:$0xff]  ;;  %s218_s1 = smov [#allocation7]  }
  0x27   :  { %v44_v2 = vand.u32 2147483647, %v40_v0  ;;  %v45_v3 = vand.u32 2147483647, %v41_v1  ;;  %v42_v14 = vld [vmem:[#allocation5] sm:$0xff]  ;;  %v43_v16 = vld [vmem:[#allocation5 + $0x8] sm:$0xff] }
  0x28   :  { %v52_v21 = vmax.f32 %v40_v0, 0.0  ;;  %v54_v22 = vmul.f32 %v42_v14, %v40_v0  ;;  %v53_v24 = vmax.f32 %v41_v1, 0.0  ;;  %v55_v25 = vmul.f32 %v43_v16, %v41_v1  ;;  %s115_s6 = sshll.u32 %s218_s1, 4  ;;  %s116_s6 = int_to_ptr.vmem [resolvable:$true] %s115_s6 }
  0x29   :  { %v46_v4 = vsub.f32 0.0, %v44_v2  ;;  %v47_v5 = vsub.f32 0.0, %v45_v3  ;;  %vm82_vm1 = vcmp.ge.f32.partialorder %v40_v0, 0.0  ;;  %vm83_vm3 = vcmp.ge.f32.partialorder %v41_v1, 0.0  ;;  %s186_s7 = scalar_lea.vmem %s116_s6, 128  ;;  %p191_p3 = scmp.lt.s32.totalorder %s116_s6, %s116_s6 }
  0x2a   :  { %v56_v35 = vsub.f32 %v52_v21, %v54_v22  ;;  %v96_v37 = vmul.f32 -0.5, %v42_v14  ;;  %v57_v38 = vsub.f32 %v53_v24, %v55_v25  ;;  %v97_v41 = vmul.f32 -0.5, %v43_v16  ;;  %p187_p2 = scmp.ne.s32.totalorder %s116_s6, %s186_s7  ;;  %p192_p4 = scmp.lt.s32.totalorder %s186_s7, %s186_s7 }
  0x2b   :  { %v48_v6 = vmul.f32 1.442695, %v46_v4  ;;  %v50_v7 = vmul.f32 1.442695, %v47_v5 }
  0x2c   :  { %v98_v48 = vadd.f32 0.75, %v96_v37  ;;  %v99_v51 = vadd.f32 0.75, %v97_v41  ;;  %p193_p5 = por %p192_p4, %p191_p3 }
  0x2d   :  { %130 = vpow2.f32 %v48_v6 }
  0x2e   :  { %132 = vpow2.f32 %v50_v7  ;;  %p194_p6 = pnand %p193_p5, %p187_p2 }
  0x37   :  { %v131_v8 = vpop.eup %130 }
  0x38   :  { %v133_v9 = vpop.eup %132  ;;  %v58_v10 = vadd.f32 1.0, %v131_v8  ;;  %v61_v12 = vmul.f32 -0.5, %v131_v8  ;;  %v64_v17 = vand.u32 2147483647, %v131_v8 }
  0x39   :  { %v67_v11 = vadd.f32 1.0, %v133_v9  ;;  %v70_v13 = vmul.f32 -0.5, %v133_v9  ;;  %v73_v19 = vand.u32 2147483647, %v133_v9 }
  0x3a   :  { %134 = vlog2.f32 %v58_v10  ;;  %v62_v15 = vadd.f32 1.0, %v61_v12  ;;  %vm258_vm0 = vcmp.lt.f32.partialorder %v64_v17, 0.0004427343 }
  0x3b   :  { %136 = vlog2.f32 %v67_v11  ;;  %v71_v18 = vadd.f32 1.0, %v70_v13  ;;  %vm262_vm2 = vcmp.lt.f32.partialorder %v73_v19, 0.0004427343 }
  0x3c   :  { %138 = vrcp.f32 %v58_v10  ;;  %v63_v27 = vmul.f32 %v131_v8, %v62_v15 }
  0x3d   :  { %140 = vrcp.f32 %v67_v11  ;;  %v72_v31 = vmul.f32 %v133_v9, %v71_v18 }
  0x44   :  { %v135_v20 = vpop.eup %134 }
  0x45   :  { %v137_v23 = vpop.eup %136  ;;  %v60_v26 = vmul.f32 0.6931472, %v135_v20 }
  0x46   :  { %v139_v28 = vpop.eup %138  ;;  %v69_v30 = vmul.f32 0.6931472, %v137_v23 }
  0x47   :  { %v141_v32 = vpop.eup %140  ;;  %v84_v34 = vmul.f32 %v139_v28, %v131_v8  ;;  %v66_v39 = vsel %vm258_vm0, %v63_v27, %v60_v26 }
  0x48   :  { %v85_v36 = vmul.f32 %v141_v32, %v133_v9  ;;  %v75_v42 = vsel %vm262_vm2, %v72_v31, %v69_v30  ;;  %v76_v46 = vadd.f32 %v66_v39, %v56_v35 }
  0x49   :  { %v86_v40 = vsel %vm82_vm1, %v139_v28, %v84_v34  ;;  %v77_v49 = vadd.f32 %v75_v42, %v57_v38 }
  0x4a   :  { %v87_v43 = vsel %vm83_vm3, %v141_v32, %v85_v36  ;;  %v88_v44 = vmul.f32 2.0, %v86_v40  ;;  %v102_v55 = vmul.f32 %v98_v48, %v76_v46 }
  0x4b   :  { %v89_v45 = vmul.f32 2.0, %v87_v43  ;;  %v103_v57 = vmul.f32 %v99_v51, %v77_v49 }
  0x4c   :  { %v90_v47 = vsub.f32 1.0, %v88_v44 }
  0x4d   :  { %v91_v50 = vsub.f32 1.0, %v89_v45 }
  0x4e   :  { %v92_v52 = vmul.f32 %v90_v47, %v42_v14 }
  0x4f   :  { %v93_v53 = vmul.f32 %v91_v50, %v43_v16 }
  0x50   :  { %v94_v54 = vadd.f32 %v92_v52, %v86_v40 }
  0x51   :  { %v95_v56 = vadd.f32 %v93_v53, %v87_v43 }
  0x52   :  { %v100_v58 = vmul.f32 %v94_v54, %v94_v54 }
  0x53   :  { %v101_v59 = vmul.f32 %v95_v56, %v95_v56 }
  0x54   :  { %v104_v60 = vmul.f32 %v102_v55, %v100_v58 }
  0x55   :  { %v105_v61 = vmul.f32 %v103_v57, %v101_v59 }
  0x57   :  { %v106_v62 = vadd.f32 %v105_v61, %v104_v60 }
  0x59   :  { %108 = vst [vmem:[#allocation7] sm:$0xff] %v106_v62 }
  0x5a   :  { %197 = shalt.err (!%p194_p6)
}
  0x5b   :  { %s198_s10 = scalar_lea.hbm %s284_s2, 128 }
  0x5c   :  { %p199_p7 = scmp.ne.s32.totalorder %s284_s2, %s198_s10  ;;  %p202_p8 = scmp.lt.u32.totalorder %s198_s10, %s284_s2 }
  0x5e   :  { %p204_p9 = pnand %p202_p8, %p199_p7 }
  0x60   :  { %207 = shalt.err (!%p204_p9)
}
  0x61   :  { %118 = dma.vmem_to_hbm [thread:$0]  %s116_s6, 128, %s284_s2, [#allocation4]  }
  0x62   :  { %212 = dma.done.wait [#allocation4], 128  }
  0x63   :  { %213 = vsyncadd [#allocation4], 4294967168 }
  0x64   :  { %122 = vsyncpa [#allocation3], 1 }
  0x65   :  { %123 = vsyncpa [#allocation6], 1 }
  0x66   :  { %124 = vsyncpa [#allocation4], 1 }

</bundles_post_ra>
